<compile_context>
chip_gen: v6e
topology: v6e:2x2x1
jax: 0.10.0
libtpu: 0.0.40
codegen_flags: <defaults>
</compile_context>

<pallas_src>
import jax
import jax.numpy as jnp
from jax.experimental import pallas as pl
from jax.experimental.pallas import tpu as pltpu


def _make_identity_copy_kernel(chunk_bounds):
    """Build a copy kernel for static (start, size) chunks along axis 0."""

    def kernel(x_hbm, o_hbm, sems):
        copies = []
        for i, (start, size) in enumerate(chunk_bounds):
            if len(chunk_bounds) == 1 and start == 0:
                # Single DMA over the whole array (common small-array case).
                src, dst = x_hbm, o_hbm
            else:
                src = x_hbm.at[pl.ds(start, size)]
                dst = o_hbm.at[pl.ds(start, size)]
            copies.append(pltpu.make_async_copy(src, dst, sems.at[i]))
        # Start every chunk DMA before waiting on any, so multiple copies are
        # in flight simultaneously (better HBM bandwidth utilization).
        for c in copies:
            c.start()
        for c in copies:
            c.wait()

    return kernel


def identity_forward(x, *, max_chunks=4, min_chunk_bytes=4 * 1024 * 1024):
    """Pallas TPU implementation of Identity.forward.

    Performs a direct HBM->HBM copy of `x` via async DMAs (no VMEM staging,
    no padding).  JAX arrays are immutable, so returning a fresh buffer is
    semantically identical to returning `x` itself.
    """
    x = jnp.asarray(x)
    if x.ndim == 0 or x.size == 0:
        # Degenerate cases: nothing worth a DMA; Identity may alias its input.
        return x

    total_bytes = x.size * x.dtype.itemsize
    d0 = x.shape[0]

    # Chunk along the leading axis only when it is not one of the two
    # layout-tiled trailing dims and the array is large enough that multiple
    # in-flight DMAs actually help; otherwise a single full-array DMA.
    if x.ndim >= 3 and d0 >= 2 and total_bytes >= 2 * min_chunk_bytes:
        num_chunks = int(min(max_chunks, d0,
                             max(1, total_bytes // min_chunk_bytes)))
    else:
        num_chunks = 1

    base, rem = divmod(d0, num_chunks)
    bounds = []
    start = 0
    for i in range(num_chunks):
        size = base + (1 if i < rem else 0)
        if size > 0:
            bounds.append((start, size))
        start += size
    bounds = tuple(bounds)

    kernel = _make_identity_copy_kernel(bounds)
    return pl.pallas_call(
        kernel,
        out_shape=jax.ShapeDtypeStruct(x.shape, x.dtype),
        in_specs=[pl.BlockSpec(memory_space=pl.ANY)],
        out_specs=pl.BlockSpec(memory_space=pl.ANY),
        scratch_shapes=[pltpu.SemaphoreType.DMA((len(bounds),))],
    )(x)


if __name__ == "__main__":
    key = jax.random.PRNGKey(0)
    # Small shape consistent with the module's generic forward(x).
    x = jax.random.normal(key, (2, 4, 16, 16), dtype=jnp.float32)
    y = identity_forward(x)
    jax.block_until_ready(y)
    assert y.shape == x.shape and y.dtype == x.dtype
    assert jnp.array_equal(y, x)

    # Ragged, non-vreg-multiple shape: no padding or slicing needed on the
    # direct-DMA path.
    x_odd = jax.random.normal(jax.random.PRNGKey(1), (3, 5, 7), dtype=jnp.float32)
    y_odd = identity_forward(x_odd)
    jax.block_until_ready(y_odd)
    assert jnp.array_equal(y_odd, x_odd)

    # Exercise the multi-chunk (several in-flight DMAs) path on a small array
    # by lowering the chunk-size threshold.
    x_big = jax.random.normal(jax.random.PRNGKey(2), (16, 64, 128),
                              dtype=jnp.bfloat16)
    y_big = identity_forward(x_big, max_chunks=4, min_chunk_bytes=32 * 1024)
    jax.block_until_ready(y_big)
    assert y_big.dtype == x_big.dtype
    assert jnp.array_equal(y_big, x_big)

    print("KERNEL_OK")
</pallas_src>

<mosaic_0001>
module attributes {stable_mosaic.version = 11 : i64} {
  func.func @kernel(%arg0: memref<2x4x16x16xf32, #tpu.memory_space<any>>, %arg1: memref<2x4x16x16xf32, #tpu.memory_space<any>>, %arg2: memref<1x!tpu.dma_semaphore, #tpu.memory_space<semaphore_mem>>) attributes {dimension_semantics = [], scalar_prefetch = 0 : i64, scratch_operands = 1 : i64, tpu.core_type = #tpu.core_type<tc>} {
    %c0_i32 = arith.constant 0 : i32
    %0 = tpu.memref_slice %arg2[%c0_i32] : memref<1x!tpu.dma_semaphore, #tpu.memory_space<semaphore_mem>> -> memref<1x!tpu.dma_semaphore, #tpu.memory_space<semaphore_mem>>
    %1 = tpu.memref_squeeze %0 : memref<1x!tpu.dma_semaphore, #tpu.memory_space<semaphore_mem>> -> memref<!tpu.dma_semaphore, #tpu.memory_space<semaphore_mem>>
    tpu.enqueue_dma source(%arg0 : memref<2x4x16x16xf32, #tpu.memory_space<any>>) target(%arg1 : memref<2x4x16x16xf32, #tpu.memory_space<any>>) target_semaphore(%1 : memref<!tpu.dma_semaphore, #tpu.memory_space<semaphore_mem>>)
    %c0_i32_0 = arith.constant 0 : i32
    %2 = tpu.memref_slice %arg2[%c0_i32_0] : memref<1x!tpu.dma_semaphore, #tpu.memory_space<semaphore_mem>> -> memref<1x!tpu.dma_semaphore, #tpu.memory_space<semaphore_mem>>
    %3 = tpu.memref_squeeze %2 : memref<1x!tpu.dma_semaphore, #tpu.memory_space<semaphore_mem>> -> memref<!tpu.dma_semaphore, #tpu.memory_space<semaphore_mem>>
    tpu.wait_dma2 semaphore(%3 : memref<!tpu.dma_semaphore, #tpu.memory_space<semaphore_mem>>) src(%arg0 : memref<2x4x16x16xf32, #tpu.memory_space<any>>) dst(%arg1 : memref<2x4x16x16xf32, #tpu.memory_space<any>>)
    return
  }
}

</mosaic_0001>

<bundles_post_ra>
// kernel: tpu_custom_call.1
= control target key start
LH: loop header
LB: loop body
LE: loop exit
PB: predicated region body
PF: predicated region fallthrough
CT: control target
= control target key end

     0   :  { %s30_s6 = smov [#allocation2]   ;;  %s31_s7 = smov 131072   ;;  %s49_s0 = inlined_call_operand.hbm [shape: f32[2,4,16,16], index: 0, kind: input, shape index: {}]   ;;  %s50_s1 = inlined_call_operand.hbm [shape: f32[2,4,16,16], index: 1, kind: output, shape index: {}]  }
   0x1   :  { %s32_s8 = smov 0  }
   0x2   :  { %12 = dma.general %s49_s0, 2048, %s50_s1, %s30_s6, %s31_s7, [#allocation4], %s32_s8, 0  }
   0x3   :  { %28 = dma.done.wait [#allocation2], 2048 }
   0x4   :  { %29 = vsyncadd [#allocation2], 4294965248 }
   0x5   :  { %18 = vsyncmov [#allocation2] }
   0x8   :  { %s19_s13 = vpop.sfrf %18 }
   0x9   :  { %p24_p0 = scmp.ne.s32.totalorder %s19_s13, 0 }
   0xb   :  { %23 = shalt.err (%p24_p0)  }

</bundles_post_ra>
